<compile_context>
chip_gen: v6e
topology: v6e:2x2x1
jax: 0.10.0
libtpu: 0.0.40
codegen_flags: <defaults>
</compile_context>

<pallas_src>
import jax
import jax.numpy as jnp
from jax.experimental import pallas as pl
from jax.experimental.pallas import tpu as pltpu


def _corner_kernel(left_ref, right_ref, o_ref):
    """Gather the 4 image corners (2 channels each) for a block of Bb images.

    left_ref  : (Bb, 4, WL) corner rows [ch0*row0, ch1*row0, ch0*rowH-1,
                ch1*rowH-1], left-most WL columns (column 0 is lane 0).
    right_ref : (Bb, 4, WR) same rows, right-most WR columns (column W-1 is
                lane WR-1).  Identical block to left_ref when W is small.
    o_ref     : (Bb, 8) lanes = [TLx, TLy, TRx, TRy, BRx, BRy, BLx, BLy].
    """
    left = left_ref[...]
    right = right_ref[...]
    wr = right.shape[-1]

    lane_l = jax.lax.broadcasted_iota(jnp.int32, left.shape, 2)
    lane_r = jax.lax.broadcasted_iota(jnp.int32, right.shape, 2)
    # Exactly one lane survives each select, so the lane reduce is exact in
    # the native dtype (no lossy float32 round-trip for integer inputs).
    lvals = jnp.sum(jnp.where(lane_l == 0, left, jnp.zeros_like(left)), axis=2)       # (Bb, 4)
    rvals = jnp.sum(jnp.where(lane_r == wr - 1, right, jnp.zeros_like(right)), axis=2)  # (Bb, 4)

    # Lane order matches reshape(B, 4, 2): TL(x,y), TR(x,y), BR(x,y), BL(x,y).
    out = jnp.concatenate(
        [lvals[:, 0:2], rvals[:, 0:2], rvals[:, 2:4], lvals[:, 2:4]], axis=1)  # (Bb, 8)
    o_ref[...] = out.astype(o_ref.dtype)


def _ref_corners(t: jax.Array) -> jax.Array:
    """Pure-JAX reference of the torch indexing semantics (also the tiny-B path)."""
    H, W = t.shape[-2:]
    return jnp.stack([
        jnp.stack([t[:, 0, 0, 0],         t[:, 1, 0, 0]], axis=-1),
        jnp.stack([t[:, 0, 0, W - 1],     t[:, 1, 0, W - 1]], axis=-1),
        jnp.stack([t[:, 0, H - 1, W - 1], t[:, 1, H - 1, W - 1]], axis=-1),
        jnp.stack([t[:, 0, H - 1, 0],     t[:, 1, H - 1, 0]], axis=-1),
    ], axis=1)  # (B, 4, 2)


def extract_corner_deltas(target_hat: jax.Array, *, use_pallas: bool = True,
                          max_batch_block: int = 256) -> jax.Array:
    """target_hat: (B, C>=2, H, W) NCHW -> delta_hat: (B, 4, 2) (torch layout).

    use_pallas=False falls back to plain XLA slices — preferable for very
    small batches where pallas_call launch overhead exceeds 8 strided loads.
    """
    B, C, H, W = target_hat.shape
    assert C >= 2, "target_hat must have at least 2 channels (x/y)"

    if not use_pallas:
        return _ref_corners(target_hat)

    # 1) Slice the two corner rows of channels 0:1 -> (B, 4, W):
    #    rows = [ch0*row0, ch1*row0, ch0*rowH-1, ch1*rowH-1].
    rows = jnp.concatenate(
        [target_hat[:, 0:2, 0, :], target_hat[:, 0:2, H - 1, :]], axis=1)

    # 2) Column blocking: fetch only the corner columns when W allows it.
    if W >= 256 and W % 128 == 0:
        wl = wr = 128
        rcol = W // 128 - 1
    else:
        wl = wr = W
        rcol = 0

    # 3) Batch blocking, capped so double-buffered inputs stay well under the
    #    default scoped-VMEM limit on every generation (v7x: 64 MiB physical).
    itemsize = jnp.dtype(target_hat.dtype).itemsize
    per_image_bytes = 4 * (wl + wr) * itemsize
    vmem_cap = max(8, (8 << 20) // per_image_bytes)
    bb = min(B, max_batch_block, vmem_cap)
    if bb < B:
        # Partial-batch blocks: keep the output sublane dim tile-divisible
        # for every dtype (f32: 8, bf16: 16, int8: 32).
        bb = max(32, (bb // 32) * 32)
    n_blocks = pl.cdiv(B, bb)
    bp = n_blocks * bb
    if bp != B:
        rows = jnp.pad(rows, ((0, bp - B), (0, 0), (0, 0)))

    out = pl.pallas_call(
        _corner_kernel,
        out_shape=jax.ShapeDtypeStruct((bp, 8), target_hat.dtype),
        grid_spec=pltpu.PrefetchScalarGridSpec(
            num_scalar_prefetch=0,
            grid=(n_blocks,),
            in_specs=[
                # Left-most corner columns of the corner-row slab.
                pl.BlockSpec((bb, 4, wl), lambda b: (b, 0, 0)),
                # Right-most corner columns (same array passed twice).
                pl.BlockSpec((bb, 4, wr), lambda b: (b, 0, rcol)),
            ],
            # Each grid step writes its own lane-dense (Bb, 8) block.
            out_specs=pl.BlockSpec((bb, 8), lambda b: (b, 0)),
        ),
        compiler_params=pltpu.CompilerParams(
            # Output blocks are per-step exclusive -> parallel batch axis
            # (engages both TensorCores on v7x; neutral on v5e/v6e).
            dimension_semantics=("parallel",)),
    )(rows, rows)

    return out[:B].reshape(B, 4, 2)


class NoOpHead:
    """JAX mirror of the PyTorch NoOpHead forward()."""

    def __init__(self, target_gen, learning_keys):
        self.target_gen = target_gen
        self.learning_keys = learning_keys

    def __call__(self, data):
        ret = []
        for key in self.learning_keys[:-1]:
            ret.append(data[key])
        if self.target_gen == '4_points':
            ret.append(data[self.learning_keys[-1]])
        elif self.target_gen == 'all_points':
            target_hat = data[self.learning_keys[-1]]
            ret.append(extract_corner_deltas(target_hat))
        else:
            raise AssertionError('I didnt understand that!')
        return ret

    # TODO(synk): predict_homography/_postprocess use cv2 RANSAC homography
    # fitting (host-side NumPy/OpenCV, not part of forward) and are not ported.


if __name__ == "__main__":
    key = jax.random.PRNGKey(0)
    k1, k2, k3, k4, k5 = jax.random.split(key, 5)

    B, H, W = 2, 16, 16
    # Pass-through tensors (arbitrary contents, just routed).
    image_1 = jax.random.normal(k1, (B, 4, H, W), dtype=jnp.float32)
    image_2 = jax.random.normal(k2, (B, 4, H, W), dtype=jnp.float32)
    # Perspective-field prediction: (B, 2, H, W) NCHW.
    target_hat = jax.random.normal(k3, (B, 2, H, W), dtype=jnp.float32)

    data = {
        'image_1': image_1,
        'image_2': image_2,
        'perspective_field': target_hat,
    }

    head = NoOpHead(target_gen='all_points',
                    learning_keys=['image_1', 'image_2', 'perspective_field'])
    ret = head(data)
    for r in ret:
        jax.block_until_ready(r)

    delta_hat = ret[-1]
    ref = _ref_corners(target_hat)
    assert delta_hat.shape == (B, 4, 2), delta_hat.shape
    assert ret[0].shape == image_1.shape and ret[1].shape == image_2.shape
    assert jnp.array_equal(delta_hat, ref), "corner extraction mismatch"

    # C > 2, odd H, W not a multiple of 128 (single full-W column block path).
    t2 = jax.random.normal(k4, (3, 3, 12, 20), dtype=jnp.float32)
    d2 = jax.block_until_ready(extract_corner_deltas(t2))
    assert d2.shape == (3, 4, 2), d2.shape
    assert jnp.array_equal(d2, _ref_corners(t2)), "C>2 / odd-H corner mismatch"

    # Column-split path (W multiple of 128, >= 256) with bf16 dtype.
    t3 = jax.random.normal(k5, (5, 2, 8, 256), dtype=jnp.bfloat16)
    d3 = jax.block_until_ready(extract_corner_deltas(t3))
    assert d3.shape == (5, 4, 2), d3.shape
    assert jnp.array_equal(d3, _ref_corners(t3)), "column-split / bf16 mismatch"

    print("KERNEL_OK")
</pallas_src>

<mosaic_0001>
module attributes {stable_mosaic.version = 11 : i64} {
  func.func @_corner_kernel(%arg0: i32, %arg1: memref<2x4x16xf32, #tpu.memory_space<vmem>>, %arg2: memref<2x4x16xf32, #tpu.memory_space<vmem>>, %arg3: memref<2x8xf32, #tpu.memory_space<vmem>>) attributes {dimension_semantics = [#tpu.dimension_semantics<parallel>], iteration_bounds = array<i64: 1>, scalar_prefetch = 0 : i64, scratch_operands = 0 : i64, tpu.core_type = #tpu.core_type<tc>, window_params = [{transform_indices = @transform_0, window_bounds = array<i64: 2, 4, 16>}, {transform_indices = @transform_1, window_bounds = array<i64: 2, 4, 16>}, {transform_indices = @transform_2, window_bounds = array<i64: 2, 8>}]} {
    %c0 = arith.constant 0 : index
    %c0_0 = arith.constant 0 : index
    %c0_1 = arith.constant 0 : index
    %0 = vector.load %arg1[%c0, %c0_0, %c0_1] : memref<2x4x16xf32, #tpu.memory_space<vmem>>, vector<2x4x16xf32>
    %c0_2 = arith.constant 0 : index
    %c0_3 = arith.constant 0 : index
    %c0_4 = arith.constant 0 : index
    %1 = vector.load %arg2[%c0_2, %c0_3, %c0_4] : memref<2x4x16xf32, #tpu.memory_space<vmem>>, vector<2x4x16xf32>
    %2 = tpu.iota {dimensions = array<i32: 2>} : vector<2x4x16xi32>
    %3 = tpu.iota {dimensions = array<i32: 2>} : vector<2x4x16xi32>
    %c0_i32 = arith.constant 0 : i32
    %4 = vector.broadcast %c0_i32 : i32 to vector<2x4x16xi32>
    %5 = arith.cmpi eq, %2, %4 : vector<2x4x16xi32>
    %cst = arith.constant 0.000000e+00 : f32
    %6 = vector.broadcast %cst : f32 to vector<2x4x16xf32>
    %7 = arith.select %5, %0, %6 : vector<2x4x16xi1>, vector<2x4x16xf32>
    %cst_5 = arith.constant dense<0.000000e+00> : vector<2x4xf32>
    %8 = vector.multi_reduction <add>, %7, %cst_5 [2] : vector<2x4x16xf32> to vector<2x4xf32>
    %c15_i32 = arith.constant 15 : i32
    %9 = vector.broadcast %c15_i32 : i32 to vector<2x4x16xi32>
    %10 = arith.cmpi eq, %3, %9 : vector<2x4x16xi32>
    %cst_6 = arith.constant 0.000000e+00 : f32
    %11 = vector.broadcast %cst_6 : f32 to vector<2x4x16xf32>
    %12 = arith.select %10, %1, %11 : vector<2x4x16xi1>, vector<2x4x16xf32>
    %cst_7 = arith.constant dense<0.000000e+00> : vector<2x4xf32>
    %13 = vector.multi_reduction <add>, %12, %cst_7 [2] : vector<2x4x16xf32> to vector<2x4xf32>
    %14 = vector.extract_strided_slice %8 {offsets = [0, 0], sizes = [2, 2], strides = [1, 1]} : vector<2x4xf32> to vector<2x2xf32>
    %15 = vector.extract_strided_slice %13 {offsets = [0, 0], sizes = [2, 2], strides = [1, 1]} : vector<2x4xf32> to vector<2x2xf32>
    %16 = vector.extract_strided_slice %13 {offsets = [0, 2], sizes = [2, 2], strides = [1, 1]} : vector<2x4xf32> to vector<2x2xf32>
    %17 = vector.extract_strided_slice %8 {offsets = [0, 2], sizes = [2, 2], strides = [1, 1]} : vector<2x4xf32> to vector<2x2xf32>
    %18 = tpu.concatenate %14, %15, %16, %17 in 1 : vector<2x2xf32>, vector<2x2xf32>, vector<2x2xf32>, vector<2x2xf32> -> vector<2x8xf32>
    %c0_8 = arith.constant 0 : index
    %c0_9 = arith.constant 0 : index
    %19 = vector.load %arg3[%c0_8, %c0_9] : memref<2x8xf32, #tpu.memory_space<vmem>>, vector<2x8xf32>
    tpu.vector_store %arg3[%c0_8, %c0_9], %18 {strides = array<i32>} : memref<2x8xf32, #tpu.memory_space<vmem>>, vector<2x8xf32>,
    return
  }
  func.func @transform_0(%arg0: i32) -> (i32, i32, i32) {
    %c0_i32 = arith.constant 0 : i32
    %c0_i32_0 = arith.constant 0 : i32
    %c0_i32_1 = arith.constant 0 : i32
    return %arg0, %c0_i32, %c0_i32_0 : i32, i32, i32
  }
  func.func @transform_1(%arg0: i32) -> (i32, i32, i32) {
    %c0_i32 = arith.constant 0 : i32
    %c0_i32_0 = arith.constant 0 : i32
    %c0_i32_1 = arith.constant 0 : i32
    return %arg0, %c0_i32, %c0_i32_0 : i32, i32, i32
  }
  func.func @transform_2(%arg0: i32) -> (i32, i32) {
    %c0_i32 = arith.constant 0 : i32
    %c0_i32_0 = arith.constant 0 : i32
    return %arg0, %c0_i32 : i32, i32
  }
}

</mosaic_0001>

<bundles_post_ra>
// kernel: tpu_custom_call.1
= control target key start
LH: loop header
LB: loop body
LE: loop exit
PB: predicated region body
PF: predicated region fallthrough
CT: control target
= control target key end

     0   :  { %7 = vsyncpa [#allocation3], 0  ;;  %s229_s0 = inlined_call_operand.hbm [shape: f32[2,4,16], index: 0, kind: input, shape index: {}]   ;;  %s230_s1 = inlined_call_operand.hbm [shape: f32[2,4,16], index: 1, kind: input, shape index: {}]   ;;  %s231_s2 = inlined_call_operand.hbm [shape: f32[2,8], index: 2, kind: output, shape index: {}]  }
   0x1   :  { %8 = vsyncpa [#allocation6], 0 }
   0x2   :  { %9 = vsyncpa [#allocation4], 0  ;;  %s197_s9 = smov [#allocation2]  }
   0x3   :  { %s15_s10 = sshll.u32 %s197_s9, 4  ;;  %s16_s10 = int_to_ptr.vmem [resolvable:$true] %s15_s10 }
   0x4   :  { %s139_s11 = scalar_lea.vmem %s16_s10, 128  ;;  %p144_p1 = scmp.lt.s32.totalorder %s16_s10, %s16_s10 }
   0x5   :  { %p140_p0 = scmp.ne.s32.totalorder %s16_s10, %s139_s11  ;;  %p145_p2 = scmp.lt.s32.totalorder %s139_s11, %s139_s11 }
   0x7   :  { %p146_p3 = por %p145_p2, %p144_p1 }
   0x9   :  { %p147_p4 = pnand %p146_p3, %p140_p0 }
   0xb   :  { %150 = shalt.err (!%p147_p4)
}
   0xc   :  { %s198_s12 = smov 64   ;;  %s199_s13 = smov 4  }
   0xd   :  { %21 = dma.hbm_to_vmem [thread:$0]  %s229_s0, 128, %s16_s10, [#allocation3], %s198_s12, %s198_s12, %s199_s13  }
   0xe   :  { %s200_s16 = smov [#allocation5]  }
   0xf   :  { %s27_s17 = sshll.u32 %s200_s16, 4  ;;  %s28_s17 = int_to_ptr.vmem [resolvable:$true] %s27_s17 }
  0x10   :  { %s159_s18 = scalar_lea.vmem %s28_s17, 128  ;;  %p164_p6 = scmp.lt.s32.totalorder %s28_s17, %s28_s17 }
  0x11   :  { %p160_p5 = scmp.ne.s32.totalorder %s28_s17, %s159_s18  ;;  %p165_p7 = scmp.lt.s32.totalorder %s159_s18, %s159_s18 }
  0x13   :  { %p166_p8 = por %p165_p7, %p164_p6 }
  0x15   :  { %p167_p9 = pnand %p166_p8, %p160_p5 }
  0x17   :  { %170 = shalt.err (!%p167_p9)
}
  0x18   :  { %33 = dma.hbm_to_vmem [thread:$0]  %s230_s1, 128, %s28_s17, [#allocation6], %s198_s12, %s198_s12, %s199_s13  }
  0x19   :  { %191 = dma.done.wait [#allocation3], 128  }
  0x1a   :  { %192 = vsyncadd [#allocation3], 4294967168 }
  0x1b   :  { %193 = dma.done.wait [#allocation6], 128  }
  0x1c   :  { %194 = vsyncadd [#allocation6], 4294967168  ;;  %v44_v0 = vlaneseq  ;;  %vm49_vm2 = vcmask 125952   ;;  %v42_v5 = vld [vmem:[#allocation5] sm:$0xf]  ;;  %vm75_vm3 = vcmask 1041409  }
  0x1d   :  { %v40_v6 = vld [vmem:[#allocation2] sm:$0xf]  ;;  %v43_v7 = vld [vmem:[#allocation5 + $0x4] sm:$0xf]  ;;  %v41_v11 = vld [vmem:[#allocation2 + $0x4] sm:$0xf] }
  0x1e   :  { %v45_v1 = vand.u32 127, %v44_v0  ;;  %v68_v2 = vshrl.u32 %v44_v0, 7  ;;  %vm102_vm4 = vcmask 15360   ;;  %vm104_vm5 = vcmask 31744   ;;  %s201_s0 = smov [#allocation7]  }
  0x1f   :  { %s116_s1 = sshll.u32 %s201_s0, 4  ;;  %vm106_vm6 = vcmask 48128   ;;  %vm108_vm7 = vcmask 58368   ;;  %s117_s1 = int_to_ptr.vmem [resolvable:$true] %s116_s1 }
  0x20   :  { %v80_v3 = vadd.s32 4294967294, %v45_v1  ;;  %vm56_vm0 = vcmp.eq.s32.totalorder %v45_v1, 15  ;;  %vm46_vm1 = vcmp.eq.s32.totalorder %v45_v1, 0  ;;  %v91_v17 = vadd.s32 4294967292, %v45_v1  ;;  %s171_s21 = scalar_lea.vmem %s117_s1, 32  ;;  %p176_p11 = scmp.lt.s32.totalorder %s117_s1, %s117_s1 }
  0x21   :  { %v57_v8 = vsel %vm56_vm0, %v42_v5, 0.0  ;;  %v47_v9 = vsel %vm46_vm1, %v40_v6, 0.0  ;;  %v58_v10 = vsel %vm56_vm0, %v43_v7, 0.0  ;;  %v48_v14 = vsel %vm46_vm1, %v41_v11, 0.0  ;;  %p172_p10 = scmp.ne.s32.totalorder %s117_s1, %s171_s21  ;;  %p177_p12 = scmp.lt.s32.totalorder %s171_s21, %s171_s21 }
  0x22   :  { %v83_v4 = vsub.s32 %v80_v3, %v68_v2  ;;  %v59_v12 = vsel %vm49_vm2, %v57_v8, 0.0  ;;  %v50_v13 = vsel %vm49_vm2, %v47_v9, 0.0  ;;  %v62_v15 = vsel %vm49_vm2, %v58_v10, 0.0 }
  0x23   :  { %60 = vadd.xlane.f32.xlu1 %v59_v12  ;;  %51 = vadd.xlane.f32.xlu0 %v50_v13  ;;  %v53_v16 = vsel %vm49_vm2, %v48_v14, 0.0  ;;  %v69_v18 = vsub.s32 %v45_v1, %v68_v2  ;;  %v94_v19 = vsub.s32 %v91_v17, %v68_v2  ;;  %p178_p13 = por %p177_p12, %p176_p11 }
  0x25   :  { %p179_p0 = pnand %p178_p13, %p172_p10 }
  0x27   :  { %63 = vadd.xlane.f32.xlu1 %v62_v15  ;;  %54 = vadd.xlane.f32.xlu0 %v53_v16 }
  0xac   :  { %v61_v20 = vpop.xlane.xlu1 %60  ;;  %v52_v21 = vpop.xlane.xlu0 %51 }
  0xad   :  { %v84_v22 = vrot.slane %v61_v20, %v83_v4  ;;  %v70_v25 = vrot.slane %v52_v21, %v69_v18  ;;  %v95_v29 = vrot.slane %v52_v21, %v94_v19 }
  0xb0   :  { %v64_v23 = vpop.xlane.xlu1 %63  ;;  %v55_v24 = vpop.xlane.xlu0 %54 }
  0xb1   :  { %v88_v26 = vrot.slane %v64_v23, %v83_v4  ;;  %v74_v27 = vrot.slane %v55_v24, %v69_v18  ;;  %v99_v28 = vrot.slane %v55_v24, %v94_v19 }
  0xb3   :  { %v89_v30 = vsel %vm75_vm3, %v88_v26, %v84_v22  ;;  %v76_v31 = vsel %vm75_vm3, %v74_v27, %v70_v25  ;;  %v100_v33 = vsel %vm75_vm3, %v99_v28, %v95_v29 }
  0xb4   :  { %v103_v32 = vsel %vm102_vm4, %v76_v31, %v89_v30 }
  0xb5   :  { %v105_v34 = vsel %vm104_vm5, %v103_v32, %v89_v30 }
  0xb6   :  { %v107_v35 = vsel %vm106_vm6, %v105_v34, %v100_v33 }
  0xb7   :  { %109 = vst.msk [vmem:[#allocation7] sm:$0x3] %vm108_vm7, %v107_v35 }
  0xb8   :  { %182 = shalt.err (!%p179_p0)
}
  0xb9   :  { %119 = dma.vmem_to_hbm [thread:$0]  %s117_s1, 32, %s231_s2, [#allocation4]  }
  0xba   :  { %195 = dma.done.wait [#allocation4], 32  }
  0xbb   :  { %196 = vsyncadd [#allocation4], 4294967264 }
  0xbc   :  { %123 = vsyncpa [#allocation3], 1 }
  0xbd   :  { %124 = vsyncpa [#allocation6], 1 }
  0xbe   :  { %125 = vsyncpa [#allocation4], 1 }

</bundles_post_ra>
